<compile_context>
chip_gen: v7x
topology: tpu7x:2x2x1
jax: 0.10.0
libtpu: 0.0.40
codegen_flags: <defaults>
</compile_context>

<pallas_src>
import jax
import jax.numpy as jnp
from jax.experimental import pallas as pl
from jax.experimental.pallas import tpu as pltpu


def _round_up(x, m):
    return (x + m - 1) // m * m


def _conv_bn_relu_kernel(p_ref, w_ref, shift_ref, o_ref, acc_ref):
    """grid = (M tiles, K tiles); K is a reduction axis.

    p_ref:     (tm, tk)     bf16 patch tile
    w_ref:     (tk, Coutp)  bf16 weight tile (BN scale pre-folded)
    shift_ref: (1, Coutp)   f32 folded BN shift
    o_ref:     (tm, Coutp)  f32 output tile
    acc_ref:   (tm, Coutp)  f32 accumulator scratch
    """
    k = pl.program_id(1)

    @pl.when(k == 0)
    def _():
        acc_ref[...] = jnp.zeros_like(acc_ref)

    acc_ref[...] += jnp.dot(p_ref[...], w_ref[...],
                            preferred_element_type=jnp.float32)

    @pl.when(k == pl.num_programs(1) - 1)
    def _():
        y = acc_ref[...] + shift_ref[...]
        o_ref[...] = jnp.maximum(y, 0.0).astype(o_ref.dtype)


def normal_conv_forward(x, conv_w, gamma, beta, run_mean, run_var, stride,
                        eps=1e-5, tm=512):
    """x: (B, Cin, T, H, W) f32; conv_w: (Cout, Cin, 3, 3, 3); BN params (Cout,).
    Returns (B, Cout, T, Ho, Wo) f32, matching PyTorch NormalConv.forward (eval)."""
    B, Cin, T, H, W = x.shape
    Cout = conv_w.shape[0]
    s = int(stride)
    Ho = (H + 2 - 3) // s + 1
    Wo = (W + 2 - 3) // s + 1

    # ---- glue: channels-last + zero-pad + im2col (pure data movement) ----
    # NCDHW in/out layout is kept to preserve the module's forward semantics.
    x_cl = jnp.transpose(x, (0, 2, 3, 4, 1)).astype(jnp.bfloat16)   # (B,T,H,W,Cin)
    xp = jnp.pad(x_cl, ((0, 0), (1, 1), (1, 1), (1, 1), (0, 0)))    # pad T,H,W by 1
    cols = []
    for kt in range(3):
        for kh in range(3):
            for kw in range(3):
                cols.append(xp[:, kt:kt + T,
                               kh:kh + s * (Ho - 1) + 1:s,
                               kw:kw + s * (Wo - 1) + 1:s, :])
    patches = jnp.concatenate(cols, axis=-1)            # (B,T,Ho,Wo,27*Cin) bf16

    K = 27 * Cin
    M = B * T * Ho * Wo
    patches = patches.reshape(M, K)

    # Weight (Cout,Cin,kt,kh,kw) -> (kt,kh,kw,Cin,Cout) = (K, Cout) with the
    # eval-mode BatchNorm scale folded into the columns; shift stays separate.
    inv_std = jax.lax.rsqrt(run_var.astype(jnp.float32) + eps)
    scale = gamma.astype(jnp.float32) * inv_std                       # (Cout,)
    shift = beta.astype(jnp.float32) - run_mean.astype(jnp.float32) * scale
    w_mat = jnp.transpose(conv_w, (2, 3, 4, 1, 0)).reshape(K, Cout)
    w_mat = (w_mat.astype(jnp.float32) * scale[None, :]).astype(jnp.bfloat16)

    # ---- pad to TPU-friendly tile sizes ----
    Coutp = _round_up(Cout, 128)            # lane-dense output / weight columns
    Kp = _round_up(K, 128)                  # full-width MXU contraction
    tm = max(128, min(_round_up(tm, 128), _round_up(M, 128)))
    Mp = _round_up(M, tm)

    # Zero padding in both patches (cols) and weights (rows) so padded
    # contraction terms contribute nothing; padded output cols sliced off.
    patches = jnp.pad(patches, ((0, Mp - M), (0, Kp - K)))
    w_pad = jnp.pad(w_mat, ((0, Kp - K), (0, Coutp - Cout)))
    shift_pad = jnp.pad(shift.reshape(1, Cout), ((0, 0), (0, Coutp - Cout)))

    # K tile: largest of {512, 256, 128} dividing Kp.
    tk = 128
    for cand in (512, 256):
        if Kp % cand == 0:
            tk = cand
            break

    grid = (Mp // tm, Kp // tk)

    # Working set: double-buffered bf16 patch & weight tiles, double-buffered
    # f32 output tile, f32 accumulator, plus headroom. Capped at 48 MiB so the
    # same tiling also fits v7x's 64 MiB per-core VMEM.
    vmem_bytes = (2 * tm * tk * 2 + 2 * tk * Coutp * 2
                  + 3 * tm * Coutp * 4 + (2 << 20))
    vmem_limit = int(min(max(vmem_bytes, 16 << 20), 48 << 20))

    out = pl.pallas_call(
        _conv_bn_relu_kernel,
        out_shape=jax.ShapeDtypeStruct((Mp, Coutp), jnp.float32),
        grid_spec=pltpu.PrefetchScalarGridSpec(
            num_scalar_prefetch=0,
            grid=grid,
            in_specs=[
                pl.BlockSpec((tm, tk), lambda i, k: (i, k)),
                pl.BlockSpec((tk, Coutp), lambda i, k: (k, 0)),
                pl.BlockSpec((1, Coutp), lambda i, k: (0, 0)),
            ],
            out_specs=pl.BlockSpec((tm, Coutp), lambda i, k: (i, 0)),
            scratch_shapes=[pltpu.VMEM((tm, Coutp), jnp.float32)],
        ),
        compiler_params=pltpu.CompilerParams(
            dimension_semantics=("parallel", "arbitrary"),
            vmem_limit_bytes=vmem_limit),
    )(patches, w_pad, shift_pad)

    y = out[:M, :Cout].reshape(B, T, Ho, Wo, Cout)
    return jnp.transpose(y, (0, 4, 1, 2, 3))            # (B, Cout, T, Ho, Wo)


def _reference(x, conv_w, gamma, beta, run_mean, run_var, stride, eps=1e-5):
    y = jax.lax.conv_general_dilated(
        x, conv_w, window_strides=(1, stride, stride),
        padding=((1, 1), (1, 1), (1, 1)),
        dimension_numbers=("NCDHW", "OIDHW", "NCDHW"))
    c = lambda v: v[None, :, None, None, None]
    y = (y - c(run_mean)) / jnp.sqrt(c(run_var) + eps) * c(gamma) + c(beta)
    return jnp.maximum(y, 0.0)


if __name__ == "__main__":
    B, Cin, Cout, T, H, W, stride = 2, 4, 8, 4, 16, 16, 2

    key = jax.random.PRNGKey(0)
    k1, k2, k3, k4, k5, k6 = jax.random.split(key, 6)
    x = jax.random.normal(k1, (B, Cin, T, H, W), dtype=jnp.float32)
    fan_in = Cin * 27
    conv_w = jax.random.normal(k2, (Cout, Cin, 3, 3, 3), dtype=jnp.float32) * \
        jnp.sqrt(2.0 / fan_in)
    gamma = jax.random.uniform(k3, (Cout,), minval=0.5, maxval=1.5,
                               dtype=jnp.float32)
    beta = jax.random.normal(k4, (Cout,), dtype=jnp.float32) * 0.1
    run_mean = jax.random.normal(k5, (Cout,), dtype=jnp.float32) * 0.1
    run_var = jax.random.uniform(k6, (Cout,), minval=0.5, maxval=1.5,
                                 dtype=jnp.float32)

    out = normal_conv_forward(x, conv_w, gamma, beta, run_mean, run_var, stride)
    out = jax.block_until_ready(out)

    ref = jax.block_until_ready(
        _reference(x, conv_w, gamma, beta, run_mean, run_var, stride))

    assert out.shape == (B, Cout, T, H // stride, W // stride), out.shape
    # bf16 patch/weight inputs (f32 accumulation) -> slightly looser tolerance
    # than a pure f32 pipeline.
    if not jnp.allclose(out, ref, rtol=2e-2, atol=5e-2):
        err = float(jnp.max(jnp.abs(out - ref)))
        raise AssertionError(f"Pallas NormalConv mismatch, max abs err={err}")

    print("KERNEL_OK")
</pallas_src>

<mosaic_0001>
module attributes {stable_mosaic.version = 11 : i64} {
  func.func @_conv_bn_relu_kernel(%arg0: i32, %arg1: i32, %arg2: memref<512x128xbf16, #tpu.memory_space<vmem>>, %arg3: memref<128x128xbf16, #tpu.memory_space<vmem>>, %arg4: memref<1x128xf32, #tpu.memory_space<vmem>>, %arg5: memref<512x128xf32, #tpu.memory_space<vmem>>, %arg6: memref<512x128xf32, #tpu.memory_space<vmem>>) attributes {dimension_semantics = [#tpu.dimension_semantics<parallel>, #tpu.dimension_semantics<arbitrary>], iteration_bounds = array<i64: 1, 1>, scalar_prefetch = 0 : i64, scratch_operands = 1 : i64, tpu.core_type = #tpu.core_type<tc>, window_params = [{transform_indices = @transform_0, window_bounds = array<i64: 512, 128>}, {transform_indices = @transform_1, window_bounds = array<i64: 128, 128>}, {pipeline_mode = #tpu.pipeline_mode<synchronous>, transform_indices = @transform_2, window_bounds = array<i64: 1, 128>}, {transform_indices = @transform_3, window_bounds = array<i64: 512, 128>}]} {
    %c0_i32 = arith.constant 0 : i32
    %0 = arith.cmpi eq, %arg1, %c0_i32 : i32
    %1 = arith.extui %0 : i1 to i32
    %c0_i32_0 = arith.constant 0 : i32
    %2 = arith.cmpi ne, %1, %c0_i32_0 : i32
    scf.if %2 {
      %cst_10 = arith.constant 0.000000e+00 : f32
      %12 = vector.broadcast %cst_10 : f32 to vector<512x128xf32>
      %c0_11 = arith.constant 0 : index
      %c0_12 = arith.constant 0 : index
      %13 = vector.load %arg6[%c0_11, %c0_12] : memref<512x128xf32, #tpu.memory_space<vmem>>, vector<512x128xf32>
      tpu.vector_store %arg6[%c0_11, %c0_12], %12 {strides = array<i32>} : memref<512x128xf32, #tpu.memory_space<vmem>>, vector<512x128xf32>,
    } else {
    }
    %c0 = arith.constant 0 : index
    %c0_1 = arith.constant 0 : index
    %3 = vector.load %arg6[%c0, %c0_1] : memref<512x128xf32, #tpu.memory_space<vmem>>, vector<512x128xf32>
    %c0_2 = arith.constant 0 : index
    %c0_3 = arith.constant 0 : index
    %4 = vector.load %arg2[%c0_2, %c0_3] : memref<512x128xbf16, #tpu.memory_space<vmem>>, vector<512x128xbf16>
    %c0_4 = arith.constant 0 : index
    %c0_5 = arith.constant 0 : index
    %5 = vector.load %arg3[%c0_4, %c0_5] : memref<128x128xbf16, #tpu.memory_space<vmem>>, vector<128x128xbf16>
    %cst = arith.constant dense<0.000000e+00> : vector<512x128xf32>
    %6 = tpu.matmul %4, %5, %cst {dimension_numbers = #tpu.dot_dimension_numbers<[1], [0], [0], [1], [0, 0, 1, 1], [], []>} : vector<512x128xbf16>, vector<128x128xbf16>, vector<512x128xf32> -> vector<512x128xf32>
    %7 = arith.addf %3, %6 : vector<512x128xf32>
    %c0_6 = arith.constant 0 : index
    %c0_7 = arith.constant 0 : index
    %8 = vector.load %arg6[%c0_6, %c0_7] : memref<512x128xf32, #tpu.memory_space<vmem>>, vector<512x128xf32>
    tpu.vector_store %arg6[%c0_6, %c0_7], %7 {strides = array<i32>} : memref<512x128xf32, #tpu.memory_space<vmem>>, vector<512x128xf32>,
    %c0_i32_8 = arith.constant 0 : i32
    %9 = arith.cmpi eq, %arg1, %c0_i32_8 : i32
    %10 = arith.extui %9 : i1 to i32
    %c0_i32_9 = arith.constant 0 : i32
    %11 = arith.cmpi ne, %10, %c0_i32_9 : i32
    scf.if %11 {
      %c0_10 = arith.constant 0 : index
      %c0_11 = arith.constant 0 : index
      %12 = vector.load %arg6[%c0_10, %c0_11] : memref<512x128xf32, #tpu.memory_space<vmem>>, vector<512x128xf32>
      %c0_12 = arith.constant 0 : index
      %c0_13 = arith.constant 0 : index
      %13 = vector.load %arg4[%c0_12, %c0_13] : memref<1x128xf32, #tpu.memory_space<vmem>>, vector<1x128xf32>
      %14 = vector.broadcast %13 : vector<1x128xf32> to vector<512x128xf32>
      %15 = arith.addf %12, %14 : vector<512x128xf32>
      %cst_14 = arith.constant 0.000000e+00 : f32
      %16 = vector.broadcast %cst_14 : f32 to vector<512x128xf32>
      %17 = arith.maximumf %15, %16 : vector<512x128xf32>
      %c0_15 = arith.constant 0 : index
      %c0_16 = arith.constant 0 : index
      %18 = vector.load %arg5[%c0_15, %c0_16] : memref<512x128xf32, #tpu.memory_space<vmem>>, vector<512x128xf32>
      tpu.vector_store %arg5[%c0_15, %c0_16], %17 {strides = array<i32>} : memref<512x128xf32, #tpu.memory_space<vmem>>, vector<512x128xf32>,
    } else {
    }
    return
  }
  func.func @transform_0(%arg0: i32, %arg1: i32) -> (i32, i32) {
    %c0_i32 = arith.constant 0 : i32
    return %arg0, %arg1 : i32, i32
  }
  func.func @transform_1(%arg0: i32, %arg1: i32) -> (i32, i32) {
    %c0_i32 = arith.constant 0 : i32
    %c0_i32_0 = arith.constant 0 : i32
    return %arg1, %c0_i32 : i32, i32
  }
  func.func @transform_2(%arg0: i32, %arg1: i32) -> (i32, i32) {
    %c0_i32 = arith.constant 0 : i32
    %c0_i32_0 = arith.constant 0 : i32
    %c0_i32_1 = arith.constant 0 : i32
    return %c0_i32, %c0_i32_0 : i32, i32
  }
  func.func @transform_3(%arg0: i32, %arg1: i32) -> (i32, i32) {
    %c0_i32 = arith.constant 0 : i32
    %c0_i32_0 = arith.constant 0 : i32
    return %arg0, %c0_i32 : i32, i32
  }
}

</mosaic_0001>

<bundles_post_ra>
// kernel: tpu_custom_call.1
= control target key start
LH: loop header
LB: loop body
LE: loop exit
PB: predicated region body
PF: predicated region fallthrough
CT: control target
= control target key end

     0   :  { %8 = vsyncpa [#allocation4], 0  ;;  %s1625_s0 = inlined_call_operand.hbm [shape: bf16[512,128], index: 0, kind: input, shape index: {}]   ;;  %s1626_s1 = inlined_call_operand.hbm [shape: bf16[128,128], index: 1, kind: input, shape index: {}]   ;;  %s1627_s2 = inlined_call_operand.vmem [shape: f32[1,128], index: 2, kind: input, shape index: {}]   ;;  %s1628_s3 = inlined_call_operand.hbm [shape: f32[512,128], index: 3, kind: output, shape index: {}]  }
   0x1   :  { %9 = vsyncpa [#allocation7], 0 }
   0x2   :  { %10 = vsyncpa [#allocation5], 0  ;;  %s1493_s12 = smov [#allocation3]   ;;  %s1421_s16 = scalar_lea.hbm %s1625_s0, 4096 }
   0x3   :  { %s16_s13 = sshll.u32 %s1493_s12, 4  ;;  %p1422_p0 = scmp.ne.s32.totalorder %s1625_s0, %s1421_s16  ;;  %s17_s13 = int_to_ptr.vmem [resolvable:$true] %s16_s13 }
   0x4   :  { %p1425_p1 = scmp.lt.u32.totalorder %s1421_s16, %s1625_s0 }
   0x6   :  { %p1427_p2 = pnand %p1425_p1, %p1422_p0 }
   0x8   :  { %1430 = shalt.err (!%p1427_p2)
}
   0x9   :  { %s1431_s21 = scalar_lea.vmem %s17_s13, 4096  ;;  %p1436_p4 = scmp.lt.s32.totalorder %s17_s13, %s17_s13 }
   0xa   :  { %p1432_p3 = scmp.ne.s32.totalorder %s17_s13, %s1431_s21  ;;  %p1437_p5 = scmp.lt.s32.totalorder %s1431_s21, %s1431_s21 }
   0xc   :  { %p1438_p6 = por %p1437_p5, %p1436_p4 }
   0xe   :  { %p1439_p7 = pnand %p1438_p6, %p1432_p3 }
  0x10   :  { %1442 = shalt.err (!%p1439_p7)
}
  0x11   :  { %s1494_s22 = smov 64   ;;  %s1495_s23 = smov 4  }
  0x12   :  { %22 = dma.hbm_to_vmem [thread:$0]  %s1625_s0, 4096, %s17_s13, [#allocation4], %s1494_s22, %s1494_s22, %s1495_s23  }
  0x13   :  { %s1496_s26 = smov [#allocation6]   ;;  %s1443_s30 = scalar_lea.hbm %s1626_s1, 1024 }
  0x14   :  { %s28_s27 = sshll.u32 %s1496_s26, 4  ;;  %p1444_p8 = scmp.ne.s32.totalorder %s1626_s1, %s1443_s30  ;;  %s29_s27 = int_to_ptr.vmem [resolvable:$true] %s28_s27 }
  0x15   :  { %p1447_p9 = scmp.lt.u32.totalorder %s1443_s30, %s1626_s1 }
  0x17   :  { %p1449_p10 = pnand %p1447_p9, %p1444_p8 }
  0x19   :  { %1452 = shalt.err (!%p1449_p10)
}
  0x1a   :  { %s1453_s8 = scalar_lea.vmem %s29_s27, 1024  ;;  %p1458_p12 = scmp.lt.s32.totalorder %s29_s27, %s29_s27 }
  0x1b   :  { %p1454_p11 = scmp.ne.s32.totalorder %s29_s27, %s1453_s8  ;;  %p1459_p13 = scmp.lt.s32.totalorder %s1453_s8, %s1453_s8 }
  0x1d   :  { %p1460_p0 = por %p1459_p13, %p1458_p12 }
  0x1f   :  { %p1461_p1 = pnand %p1460_p0, %p1454_p11 }
  0x21   :  { %1464 = shalt.err (!%p1461_p1)
}
  0x22   :  { %34 = dma.hbm_to_vmem [thread:$0]  %s1626_s1, 1024, %s29_s27, [#allocation7], %s1494_s22, %s1494_s22, %s1495_s23  }
  0x23   :  { %1487 = dma.done.wait [#allocation4], 4096  }
  0x24   :  { %1488 = vsyncadd [#allocation4], 4294963200 }
  0x25   :  { %1489 = dma.done.wait [#allocation7], 1024  }
  0x26   :  { %1490 = vsyncadd [#allocation7], 4294966272  ;;  %v1381_v0 = vld [vmem:[#allocation6] sm:$0xff]   ;;  %v1382_v1 = vld [vmem:[#allocation6 + $0x8] sm:$0xff]  }
  0x27   :  { %1278 = vmatprep.subr.bf16.mxu0 %v1381_v0  ;;  %1358 = vmatprep.subr.bf16.mxu1 %v1381_v0  ;;  %v1383_v2 = vld [vmem:[#allocation6 + $0x10] sm:$0xff]   ;;  %v1384_v3 = vld [vmem:[#allocation6 + $0x18] sm:$0xff]   ;;  %v1389_v4 = vld [vmem:[#allocation3] sm:$0xff]  }
  0x28   :  { %1279 = vmatpush3.bf16.msra.mxu0 %v1381_v0  ;;  %1366 = vmatpush3.bf16.msra.mxu1 %v1381_v0  ;;  %v1390_v5 = vld [vmem:[#allocation3 + $0x80] sm:$0xff]   ;;  %v1386_v7 = vld [vmem:[#allocation6 + $0x28] sm:$0xff]   ;;  %v1387_v8 = vld [vmem:[#allocation6 + $0x30] sm:$0xff]  }
  0x29   :  { %1280 = vmatprep.subr.bf16.mxu0 %v1382_v1  ;;  %1359 = vmatprep.subr.bf16.mxu1 %v1382_v1  ;;  %v1385_v6 = vld [vmem:[#allocation6 + $0x20] sm:$0xff]   ;;  %v1388_v9 = vld [vmem:[#allocation6 + $0x38] sm:$0xff]   ;;  %v1391_v10 = vld [vmem:[#allocation3 + $0x8] sm:$0xff]  }
  0x2a   :  { %1294 = vmatprep.mubr.bf16.mxu0 %v1389_v4  ;;  %1326 = vmatprep.mubr.bf16.mxu1 %v1390_v5  ;;  %v1392_v11 = vld [vmem:[#allocation3 + $0x88] sm:$0xff]   ;;  %v1393_v12 = vld [vmem:[#allocation3 + $0x10] sm:$0xff]   ;;  %v1395_v14 = vld [vmem:[#allocation3 + $0x18] sm:$0xff]  }
  0x2b   :  { %v1394_v13 = vld [vmem:[#allocation3 + $0x90] sm:$0xff]   ;;  %v1396_v15 = vld [vmem:[#allocation3 + $0x98] sm:$0xff]   ;;  %v1397_v16 = vld [vmem:[#allocation3 + $0x20] sm:$0xff]  }
  0x2c   :  { %1281 = vmatpush3.bf16.msra.mxu0 %v1382_v1  ;;  %1367 = vmatpush3.bf16.msra.mxu1 %v1382_v1  ;;  %v1398_v17 = vld [vmem:[#allocation3 + $0xa0] sm:$0xff]   ;;  %v1399_v18 = vld [vmem:[#allocation3 + $0x28] sm:$0xff]   ;;  %v1401_v20 = vld [vmem:[#allocation3 + $0x30] sm:$0xff]  }
  0x2d   :  { %1282 = vmatprep.subr.bf16.mxu0 %v1383_v2  ;;  %1360 = vmatprep.subr.bf16.mxu1 %v1383_v2  ;;  %v1400_v19 = vld [vmem:[#allocation3 + $0xa8] sm:$0xff]   ;;  %v1402_v21 = vld [vmem:[#allocation3 + $0xb0] sm:$0xff]   ;;  %v1403_v22 = vld [vmem:[#allocation3 + $0x38] sm:$0xff]  }
  0x2e   :  { %v1404_v23 = vld [vmem:[#allocation3 + $0xb8] sm:$0xff]   ;;  %v1405_v24 = vld [vmem:[#allocation3 + $0x40] sm:$0xff]   ;;  %v1407_v26 = vld [vmem:[#allocation3 + $0x48] sm:$0xff]  }
  0x2f   :  { %v1406_v25 = vld [vmem:[#allocation3 + $0xc0] sm:$0xff]   ;;  %v1408_v27 = vld [vmem:[#allocation3 + $0xc8] sm:$0xff]   ;;  %v1409_v28 = vld [vmem:[#allocation3 + $0x50] sm:$0xff]  }
  0x30   :  { %1283 = vmatpush3.bf16.msra.mxu0 %v1383_v2  ;;  %1368 = vmatpush3.bf16.msra.mxu1 %v1383_v2  ;;  %v1410_v29 = vld [vmem:[#allocation3 + $0xd0] sm:$0xff]   ;;  %v1411_v30 = vld [vmem:[#allocation3 + $0x58] sm:$0xff]   ;;  %v1413_v32 = vld [vmem:[#allocation3 + $0x60] sm:$0xff]  }
  0x31   :  { %1284 = vmatprep.subr.bf16.mxu0 %v1384_v3  ;;  %1361 = vmatprep.subr.bf16.mxu1 %v1384_v3  ;;  %v1412_v31 = vld [vmem:[#allocation3 + $0xd8] sm:$0xff]   ;;  %v1414_v33 = vld [vmem:[#allocation3 + $0xe0] sm:$0xff]   ;;  %v1415_v34 = vld [vmem:[#allocation3 + $0x68] sm:$0xff]  }
  0x32   :  { %v1416_v35 = vld [vmem:[#allocation3 + $0xe8] sm:$0xff]   ;;  %v1417_v36 = vld [vmem:[#allocation3 + $0x70] sm:$0xff]   ;;  %v1419_v38 = vld [vmem:[#allocation3 + $0x78] sm:$0xff]  }
  0x33   :  { %v1418_v37 = vld [vmem:[#allocation3 + $0xf0] sm:$0xff]   ;;  %v1420_v39 = vld [vmem:[#allocation3 + $0xf8] sm:$0xff]   ;;  %v1547_v40 = vld [vmem:[%s1627_s2] ss:$0 sm:$0xff]  ;;  %s1497_s2 = smov [#allocation8]  }
  0x34   :  { %1285 = vmatpush3.bf16.msra.mxu0 %v1384_v3  ;;  %1369 = vmatpush3.bf16.msra.mxu1 %v1384_v3  ;;  %s1184_s11 = sshll.u32 %s1497_s2, 4  ;;  %s1185_s11 = int_to_ptr.vmem [resolvable:$true] %s1184_s11 }
  0x35   :  { %1286 = vmatprep.subr.bf16.mxu0 %v1385_v6  ;;  %1362 = vmatprep.subr.bf16.mxu1 %v1385_v6  ;;  %s1465_s12 = scalar_lea.vmem %s1185_s11, 8192  ;;  %p1470_p3 = scmp.lt.s32.totalorder %s1185_s11, %s1185_s11 }
  0x36   :  { %p1466_p2 = scmp.ne.s32.totalorder %s1185_s11, %s1465_s12  ;;  %p1471_p4 = scmp.lt.s32.totalorder %s1465_s12, %s1465_s12 }
  0x38   :  { %1287 = vmatpush3.bf16.msra.mxu0 %v1385_v6  ;;  %1370 = vmatpush3.bf16.msra.mxu1 %v1385_v6  ;;  %p1472_p5 = por %p1471_p4, %p1470_p3 }
  0x39   :  { %1288 = vmatprep.subr.bf16.mxu0 %v1386_v7  ;;  %1363 = vmatprep.subr.bf16.mxu1 %v1386_v7 }
  0x3a   :  { %p1473_p6 = pnand %p1472_p5, %p1466_p2 }
  0x3c   :  { %1289 = vmatpush3.bf16.msra.mxu0 %v1386_v7  ;;  %1371 = vmatpush3.bf16.msra.mxu1 %v1386_v7 }
  0x3d   :  { %1290 = vmatprep.subr.bf16.mxu0 %v1387_v8  ;;  %1364 = vmatprep.subr.bf16.mxu1 %v1387_v8 }
  0x40   :  { %1291 = vmatpush3.bf16.msra.mxu0 %v1387_v8  ;;  %1372 = vmatpush3.bf16.msra.mxu1 %v1387_v8 }
  0x41   :  { %1292 = vmatprep.subr.bf16.mxu0 %v1388_v9  ;;  %1365 = vmatprep.subr.bf16.mxu1 %v1388_v9 }
  0x44   :  { %1293 = vmatpush3.bf16.msra.mxu0 %v1388_v9  ;;  %1373 = vmatpush3.bf16.msra.mxu1 %v1388_v9 }
  0x47   :  { %1295 = vmatmul.mubr.bf16.vlgmr.msra.gmra.mrb[0].mxu0 %v1391_v10  ;;  %1327 = vmatmul.mubr.bf16.vlgmr.msra.gmra.mrb[0].mxu1 %v1392_v11 }
  0x48   :  { %1298 = vmatprep.mubr.bf16.mxu0 %v1393_v12  ;;  %1330 = vmatprep.mubr.bf16.mxu1 %v1394_v13 }
  0x4f   :  { %1299 = vmatmul.mubr.bf16.gmra.mrb[4].mxu0 %v1395_v14  ;;  %1331 = vmatmul.mubr.bf16.gmra.mrb[4].mxu1 %v1396_v15 }
  0x50   :  { %1302 = vmatprep.mubr.bf16.mxu0 %v1397_v16  ;;  %1334 = vmatprep.mubr.bf16.mxu1 %v1398_v17 }
  0x57   :  { %1303 = vmatmul.mubr.bf16.gmra.mrb[8].mxu0 %v1399_v18  ;;  %1335 = vmatmul.mubr.bf16.gmra.mrb[8].mxu1 %v1400_v19 }
  0x58   :  { %1306 = vmatprep.mubr.bf16.mxu0 %v1401_v20  ;;  %1338 = vmatprep.mubr.bf16.mxu1 %v1402_v21 }
  0x5f   :  { %1307 = vmatmul.mubr.bf16.gmra.mrb[12].mxu0 %v1403_v22  ;;  %1339 = vmatmul.mubr.bf16.gmra.mrb[12].mxu1 %v1404_v23 }
  0x60   :  { %1310 = vmatprep.mubr.bf16.mxu0 %v1405_v24  ;;  %1342 = vmatprep.mubr.bf16.mxu1 %v1406_v25 }
  0x67   :  { %1311 = vmatmul.mubr.bf16.gmra.mrb[16].mxu0 %v1407_v26  ;;  %1343 = vmatmul.mubr.bf16.gmra.mrb[16].mxu1 %v1408_v27 }
  0x68   :  { %1314 = vmatprep.mubr.bf16.mxu0 %v1409_v28  ;;  %1346 = vmatprep.mubr.bf16.mxu1 %v1410_v29 }
  0x6f   :  { %1315 = vmatmul.mubr.bf16.gmra.mrb[20].mxu0 %v1411_v30  ;;  %1347 = vmatmul.mubr.bf16.gmra.mrb[20].mxu1 %v1412_v31 }
  0x70   :  { %1318 = vmatprep.mubr.bf16.mxu0 %v1413_v32  ;;  %1350 = vmatprep.mubr.bf16.mxu1 %v1414_v33 }
  0x77   :  { %1319 = vmatmul.mubr.bf16.gmra.mrb[24].mxu0 %v1415_v34  ;;  %1351 = vmatmul.mubr.bf16.gmra.mrb[24].mxu1 %v1416_v35 }
  0x78   :  { %1322 = vmatprep.mubr.bf16.mxu0 %v1417_v36  ;;  %1354 = vmatprep.mubr.bf16.mxu1 %v1418_v37 }
  0x7f   :  { %1323 = vmatmul.mubr.bf16.gmra.mrb[28].mxu0 %v1419_v38  ;;  %1355 = vmatmul.mubr.bf16.gmra.mrb[28].mxu1 %v1420_v39 }
 0x11a   :  { %v1296_v41 = vpop.f32.mrb[0].mxu0  ;;  %v1328_v42 = vpop.f32.mrb[0].mxu1 }
 0x11b   :  { %v989_v43 = vadd.f32 %v1296_v41, %v1547_v40  ;;  %v1021_v44 = vadd.f32 %v1328_v42, %v1547_v40  ;;  %v530_v45 = vpop.f32.mrb[1].mxu0  ;;  %v658_v46 = vpop.f32.mrb[1].mxu1 }
 0x11c   :  { %v987_v47 = vadd.f32 %v1547_v40, %v530_v45  ;;  %v1019_v48 = vadd.f32 %v1547_v40, %v658_v46  ;;  %v1297_v49 = vpop.f32.mrb[2].mxu0  ;;  %v1329_v50 = vpop.f32.mrb[2].mxu1 }
 0x11d   :  { %v1053_v51 = vmax.f32 %v989_v43, 0.0  ;;  %v1085_v52 = vmax.f32 %v1021_v44, 0.0  ;;  %v990_v53 = vadd.f32 %v1297_v49, %v1547_v40  ;;  %v1022_v54 = vadd.f32 %v1329_v50, %v1547_v40  ;;  %v533_v55 = vpop.f32.mrb[3].mxu0  ;;  %v661_v56 = vpop.f32.mrb[3].mxu1 }
 0x11e   :  { %v1051_v57 = vmax.f32 %v987_v47, 0.0  ;;  %v1083_v58 = vmax.f32 %v1019_v48, 0.0  ;;  %v988_v59 = vadd.f32 %v1547_v40, %v533_v55  ;;  %v1020_v60 = vadd.f32 %v1547_v40, %v661_v56 }
 0x11f   :  { %1117 = vst [vmem:[#allocation8 + $0x10] sm:$0xff] %v1053_v51  ;;  %1149 = vst [vmem:[#allocation8 + $0x110] sm:$0xff] %v1085_v52  ;;  %v1054_v61 = vmax.f32 %v990_v53, 0.0  ;;  %v1086_v62 = vmax.f32 %v1022_v54, 0.0 }
 0x120   :  { %1115 = vst [vmem:[#allocation8] sm:$0xff] %v1051_v57  ;;  %1147 = vst [vmem:[#allocation8 + $0x100] sm:$0xff] %v1083_v58  ;;  %v1052_v63 = vmax.f32 %v988_v59, 0.0  ;;  %v1084_v0 = vmax.f32 %v1020_v60, 0.0 }
 0x121   :  { %1118 = vst [vmem:[#allocation8 + $0x18] sm:$0xff] %v1054_v61  ;;  %1150 = vst [vmem:[#allocation8 + $0x118] sm:$0xff] %v1086_v62 }
 0x122   :  { %1116 = vst [vmem:[#allocation8 + $0x8] sm:$0xff] %v1052_v63  ;;  %1148 = vst [vmem:[#allocation8 + $0x108] sm:$0xff] %v1084_v0  ;;  %v1300_v1 = vpop.f32.mrb[4].mxu0  ;;  %v1332_v2 = vpop.f32.mrb[4].mxu1 }
 0x123   :  { %v993_v3 = vadd.f32 %v1300_v1, %v1547_v40  ;;  %v1025_v4 = vadd.f32 %v1332_v2, %v1547_v40  ;;  %v546_v5 = vpop.f32.mrb[5].mxu0  ;;  %v674_v6 = vpop.f32.mrb[5].mxu1 }
 0x124   :  { %v991_v7 = vadd.f32 %v1547_v40, %v546_v5  ;;  %v1023_v8 = vadd.f32 %v1547_v40, %v674_v6  ;;  %v1301_v9 = vpop.f32.mrb[6].mxu0  ;;  %v1333_v10 = vpop.f32.mrb[6].mxu1 }
 0x125   :  { %v1057_v11 = vmax.f32 %v993_v3, 0.0  ;;  %v1089_v12 = vmax.f32 %v1025_v4, 0.0  ;;  %v994_v13 = vadd.f32 %v1301_v9, %v1547_v40  ;;  %v1026_v14 = vadd.f32 %v1333_v10, %v1547_v40  ;;  %v549_v15 = vpop.f32.mrb[7].mxu0  ;;  %v677_v16 = vpop.f32.mrb[7].mxu1 }
 0x126   :  { %v1055_v17 = vmax.f32 %v991_v7, 0.0  ;;  %v1087_v18 = vmax.f32 %v1023_v8, 0.0  ;;  %v992_v19 = vadd.f32 %v1547_v40, %v549_v15  ;;  %v1024_v20 = vadd.f32 %v1547_v40, %v677_v16 }
 0x127   :  { %1121 = vst [vmem:[#allocation8 + $0x30] sm:$0xff] %v1057_v11  ;;  %1153 = vst [vmem:[#allocation8 + $0x130] sm:$0xff] %v1089_v12  ;;  %v1058_v21 = vmax.f32 %v994_v13, 0.0  ;;  %v1090_v22 = vmax.f32 %v1026_v14, 0.0 }
 0x128   :  { %1119 = vst [vmem:[#allocation8 + $0x20] sm:$0xff] %v1055_v17  ;;  %1151 = vst [vmem:[#allocation8 + $0x120] sm:$0xff] %v1087_v18  ;;  %v1056_v23 = vmax.f32 %v992_v19, 0.0  ;;  %v1088_v24 = vmax.f32 %v1024_v20, 0.0 }
 0x129   :  { %1122 = vst [vmem:[#allocation8 + $0x38] sm:$0xff] %v1058_v21  ;;  %1154 = vst [vmem:[#allocation8 + $0x138] sm:$0xff] %v1090_v22 }
 0x12a   :  { %1120 = vst [vmem:[#allocation8 + $0x28] sm:$0xff] %v1056_v23  ;;  %1152 = vst [vmem:[#allocation8 + $0x128] sm:$0xff] %v1088_v24  ;;  %v1304_v25 = vpop.f32.mrb[8].mxu0  ;;  %v1336_v26 = vpop.f32.mrb[8].mxu1 }
 0x12b   :  { %v997_v27 = vadd.f32 %v1304_v25, %v1547_v40  ;;  %v1029_v28 = vadd.f32 %v1336_v26, %v1547_v40  ;;  %v562_v29 = vpop.f32.mrb[9].mxu0  ;;  %v690_v30 = vpop.f32.mrb[9].mxu1 }
 0x12c   :  { %v995_v31 = vadd.f32 %v1547_v40, %v562_v29  ;;  %v1027_v32 = vadd.f32 %v1547_v40, %v690_v30  ;;  %v1305_v33 = vpop.f32.mrb[10].mxu0  ;;  %v1337_v34 = vpop.f32.mrb[10].mxu1 }
 0x12d   :  { %v1061_v35 = vmax.f32 %v997_v27, 0.0  ;;  %v1093_v36 = vmax.f32 %v1029_v28, 0.0  ;;  %v998_v37 = vadd.f32 %v1305_v33, %v1547_v40  ;;  %v1030_v38 = vadd.f32 %v1337_v34, %v1547_v40  ;;  %v565_v39 = vpop.f32.mrb[11].mxu0  ;;  %v693_v41 = vpop.f32.mrb[11].mxu1 }
 0x12e   :  { %v1059_v42 = vmax.f32 %v995_v31, 0.0  ;;  %v1091_v43 = vmax.f32 %v1027_v32, 0.0  ;;  %v996_v44 = vadd.f32 %v1547_v40, %v565_v39  ;;  %v1028_v45 = vadd.f32 %v1547_v40, %v693_v41 }
 0x12f   :  { %1125 = vst [vmem:[#allocation8 + $0x50] sm:$0xff] %v1061_v35  ;;  %1157 = vst [vmem:[#allocation8 + $0x150] sm:$0xff] %v1093_v36  ;;  %v1062_v46 = vmax.f32 %v998_v37, 0.0  ;;  %v1094_v47 = vmax.f32 %v1030_v38, 0.0 }
 0x130   :  { %1123 = vst [vmem:[#allocation8 + $0x40] sm:$0xff] %v1059_v42  ;;  %1155 = vst [vmem:[#allocation8 + $0x140] sm:$0xff] %v1091_v43  ;;  %v1060_v48 = vmax.f32 %v996_v44, 0.0  ;;  %v1092_v49 = vmax.f32 %v1028_v45, 0.0 }
 0x131   :  { %1126 = vst [vmem:[#allocation8 + $0x58] sm:$0xff] %v1062_v46  ;;  %1158 = vst [vmem:[#allocation8 + $0x158] sm:$0xff] %v1094_v47 }
 0x132   :  { %1124 = vst [vmem:[#allocation8 + $0x48] sm:$0xff] %v1060_v48  ;;  %1156 = vst [vmem:[#allocation8 + $0x148] sm:$0xff] %v1092_v49  ;;  %v1308_v50 = vpop.f32.mrb[12].mxu0  ;;  %v1340_v51 = vpop.f32.mrb[12].mxu1 }
 0x133   :  { %v1001_v52 = vadd.f32 %v1308_v50, %v1547_v40  ;;  %v1033_v53 = vadd.f32 %v1340_v51, %v1547_v40  ;;  %v578_v54 = vpop.f32.mrb[13].mxu0  ;;  %v706_v55 = vpop.f32.mrb[13].mxu1 }
 0x134   :  { %v999_v56 = vadd.f32 %v1547_v40, %v578_v54  ;;  %v1031_v57 = vadd.f32 %v1547_v40, %v706_v55  ;;  %v1309_v58 = vpop.f32.mrb[14].mxu0  ;;  %v1341_v59 = vpop.f32.mrb[14].mxu1 }
 0x135   :  { %v1065_v60 = vmax.f32 %v1001_v52, 0.0  ;;  %v1097_v61 = vmax.f32 %v1033_v53, 0.0  ;;  %v1002_v62 = vadd.f32 %v1309_v58, %v1547_v40  ;;  %v1034_v63 = vadd.f32 %v1341_v59, %v1547_v40  ;;  %v581_v0 = vpop.f32.mrb[15].mxu0  ;;  %v709_v1 = vpop.f32.mrb[15].mxu1 }
 0x136   :  { %v1063_v2 = vmax.f32 %v999_v56, 0.0  ;;  %v1095_v3 = vmax.f32 %v1031_v57, 0.0  ;;  %v1000_v4 = vadd.f32 %v1547_v40, %v581_v0  ;;  %v1032_v5 = vadd.f32 %v1547_v40, %v709_v1 }
 0x137   :  { %1129 = vst [vmem:[#allocation8 + $0x70] sm:$0xff] %v1065_v60  ;;  %1161 = vst [vmem:[#allocation8 + $0x170] sm:$0xff] %v1097_v61  ;;  %v1066_v6 = vmax.f32 %v1002_v62, 0.0  ;;  %v1098_v7 = vmax.f32 %v1034_v63, 0.0 }
 0x138   :  { %1127 = vst [vmem:[#allocation8 + $0x60] sm:$0xff] %v1063_v2  ;;  %1159 = vst [vmem:[#allocation8 + $0x160] sm:$0xff] %v1095_v3  ;;  %v1064_v8 = vmax.f32 %v1000_v4, 0.0  ;;  %v1096_v9 = vmax.f32 %v1032_v5, 0.0 }
 0x139   :  { %1130 = vst [vmem:[#allocation8 + $0x78] sm:$0xff] %v1066_v6  ;;  %1162 = vst [vmem:[#allocation8 + $0x178] sm:$0xff] %v1098_v7 }
 0x13a   :  { %1128 = vst [vmem:[#allocation8 + $0x68] sm:$0xff] %v1064_v8  ;;  %1160 = vst [vmem:[#allocation8 + $0x168] sm:$0xff] %v1096_v9  ;;  %v1312_v10 = vpop.f32.mrb[16].mxu0  ;;  %v1344_v11 = vpop.f32.mrb[16].mxu1 }
 0x13b   :  { %v1005_v12 = vadd.f32 %v1312_v10, %v1547_v40  ;;  %v1037_v13 = vadd.f32 %v1344_v11, %v1547_v40  ;;  %v594_v14 = vpop.f32.mrb[17].mxu0  ;;  %v722_v15 = vpop.f32.mrb[17].mxu1 }
 0x13c   :  { %v1003_v16 = vadd.f32 %v1547_v40, %v594_v14  ;;  %v1035_v17 = vadd.f32 %v1547_v40, %v722_v15  ;;  %v1313_v18 = vpop.f32.mrb[18].mxu0  ;;  %v1345_v19 = vpop.f32.mrb[18].mxu1 }
 0x13d   :  { %v1069_v20 = vmax.f32 %v1005_v12, 0.0  ;;  %v1101_v21 = vmax.f32 %v1037_v13, 0.0  ;;  %v1006_v22 = vadd.f32 %v1313_v18, %v1547_v40  ;;  %v1038_v23 = vadd.f32 %v1345_v19, %v1547_v40  ;;  %v597_v24 = vpop.f32.mrb[19].mxu0  ;;  %v725_v25 = vpop.f32.mrb[19].mxu1 }
 0x13e   :  { %v1067_v26 = vmax.f32 %v1003_v16, 0.0  ;;  %v1099_v27 = vmax.f32 %v1035_v17, 0.0  ;;  %v1004_v28 = vadd.f32 %v1547_v40, %v597_v24  ;;  %v1036_v29 = vadd.f32 %v1547_v40, %v725_v25 }
 0x13f   :  { %1133 = vst [vmem:[#allocation8 + $0x90] sm:$0xff] %v1069_v20  ;;  %1165 = vst [vmem:[#allocation8 + $0x190] sm:$0xff] %v1101_v21  ;;  %v1070_v30 = vmax.f32 %v1006_v22, 0.0  ;;  %v1102_v31 = vmax.f32 %v1038_v23, 0.0 }
 0x140   :  { %1131 = vst [vmem:[#allocation8 + $0x80] sm:$0xff] %v1067_v26  ;;  %1163 = vst [vmem:[#allocation8 + $0x180] sm:$0xff] %v1099_v27  ;;  %v1068_v32 = vmax.f32 %v1004_v28, 0.0  ;;  %v1100_v33 = vmax.f32 %v1036_v29, 0.0 }
 0x141   :  { %1134 = vst [vmem:[#allocation8 + $0x98] sm:$0xff] %v1070_v30  ;;  %1166 = vst [vmem:[#allocation8 + $0x198] sm:$0xff] %v1102_v31 }
 0x142   :  { %1132 = vst [vmem:[#allocation8 + $0x88] sm:$0xff] %v1068_v32  ;;  %1164 = vst [vmem:[#allocation8 + $0x188] sm:$0xff] %v1100_v33  ;;  %v1316_v34 = vpop.f32.mrb[20].mxu0  ;;  %v1348_v35 = vpop.f32.mrb[20].mxu1 }
 0x143   :  { %v1009_v36 = vadd.f32 %v1316_v34, %v1547_v40  ;;  %v1041_v37 = vadd.f32 %v1348_v35, %v1547_v40  ;;  %v610_v38 = vpop.f32.mrb[21].mxu0  ;;  %v738_v39 = vpop.f32.mrb[21].mxu1 }
 0x144   :  { %v1007_v41 = vadd.f32 %v1547_v40, %v610_v38  ;;  %v1039_v42 = vadd.f32 %v1547_v40, %v738_v39  ;;  %v1317_v43 = vpop.f32.mrb[22].mxu0  ;;  %v1349_v44 = vpop.f32.mrb[22].mxu1 }
 0x145   :  { %v1073_v45 = vmax.f32 %v1009_v36, 0.0  ;;  %v1105_v46 = vmax.f32 %v1041_v37, 0.0  ;;  %v1010_v47 = vadd.f32 %v1317_v43, %v1547_v40  ;;  %v1042_v48 = vadd.f32 %v1349_v44, %v1547_v40  ;;  %v613_v49 = vpop.f32.mrb[23].mxu0  ;;  %v741_v50 = vpop.f32.mrb[23].mxu1 }
 0x146   :  { %v1071_v51 = vmax.f32 %v1007_v41, 0.0  ;;  %v1103_v52 = vmax.f32 %v1039_v42, 0.0  ;;  %v1008_v53 = vadd.f32 %v1547_v40, %v613_v49  ;;  %v1040_v54 = vadd.f32 %v1547_v40, %v741_v50 }
 0x147   :  { %1137 = vst [vmem:[#allocation8 + $0xb0] sm:$0xff] %v1073_v45  ;;  %1169 = vst [vmem:[#allocation8 + $0x1b0] sm:$0xff] %v1105_v46  ;;  %v1074_v55 = vmax.f32 %v1010_v47, 0.0  ;;  %v1106_v56 = vmax.f32 %v1042_v48, 0.0 }
 0x148   :  { %1135 = vst [vmem:[#allocation8 + $0xa0] sm:$0xff] %v1071_v51  ;;  %1167 = vst [vmem:[#allocation8 + $0x1a0] sm:$0xff] %v1103_v52  ;;  %v1072_v57 = vmax.f32 %v1008_v53, 0.0  ;;  %v1104_v58 = vmax.f32 %v1040_v54, 0.0 }
 0x149   :  { %1138 = vst [vmem:[#allocation8 + $0xb8] sm:$0xff] %v1074_v55  ;;  %1170 = vst [vmem:[#allocation8 + $0x1b8] sm:$0xff] %v1106_v56 }
 0x14a   :  { %1136 = vst [vmem:[#allocation8 + $0xa8] sm:$0xff] %v1072_v57  ;;  %1168 = vst [vmem:[#allocation8 + $0x1a8] sm:$0xff] %v1104_v58  ;;  %v1320_v59 = vpop.f32.mrb[24].mxu0  ;;  %v1352_v60 = vpop.f32.mrb[24].mxu1 }
 0x14b   :  { %v1013_v61 = vadd.f32 %v1320_v59, %v1547_v40  ;;  %v1045_v62 = vadd.f32 %v1352_v60, %v1547_v40  ;;  %v626_v63 = vpop.f32.mrb[25].mxu0  ;;  %v754_v0 = vpop.f32.mrb[25].mxu1 }
 0x14c   :  { %v1011_v1 = vadd.f32 %v1547_v40, %v626_v63  ;;  %v1043_v2 = vadd.f32 %v1547_v40, %v754_v0  ;;  %v1321_v3 = vpop.f32.mrb[26].mxu0  ;;  %v1353_v4 = vpop.f32.mrb[26].mxu1 }
 0x14d   :  { %v1077_v5 = vmax.f32 %v1013_v61, 0.0  ;;  %v1109_v6 = vmax.f32 %v1045_v62, 0.0  ;;  %v1014_v7 = vadd.f32 %v1321_v3, %v1547_v40  ;;  %v1046_v8 = vadd.f32 %v1353_v4, %v1547_v40  ;;  %v629_v9 = vpop.f32.mrb[27].mxu0  ;;  %v757_v10 = vpop.f32.mrb[27].mxu1 }
 0x14e   :  { %v1075_v11 = vmax.f32 %v1011_v1, 0.0  ;;  %v1107_v12 = vmax.f32 %v1043_v2, 0.0  ;;  %v1012_v13 = vadd.f32 %v1547_v40, %v629_v9  ;;  %v1044_v14 = vadd.f32 %v1547_v40, %v757_v10 }
 0x14f   :  { %1141 = vst [vmem:[#allocation8 + $0xd0] sm:$0xff] %v1077_v5  ;;  %1173 = vst [vmem:[#allocation8 + $0x1d0] sm:$0xff] %v1109_v6  ;;  %v1078_v15 = vmax.f32 %v1014_v7, 0.0  ;;  %v1110_v16 = vmax.f32 %v1046_v8, 0.0 }
 0x150   :  { %1139 = vst [vmem:[#allocation8 + $0xc0] sm:$0xff] %v1075_v11  ;;  %1171 = vst [vmem:[#allocation8 + $0x1c0] sm:$0xff] %v1107_v12  ;;  %v1076_v17 = vmax.f32 %v1012_v13, 0.0  ;;  %v1108_v18 = vmax.f32 %v1044_v14, 0.0 }
 0x151   :  { %1142 = vst [vmem:[#allocation8 + $0xd8] sm:$0xff] %v1078_v15  ;;  %1174 = vst [vmem:[#allocation8 + $0x1d8] sm:$0xff] %v1110_v16 }
 0x152   :  { %1140 = vst [vmem:[#allocation8 + $0xc8] sm:$0xff] %v1076_v17  ;;  %1172 = vst [vmem:[#allocation8 + $0x1c8] sm:$0xff] %v1108_v18  ;;  %v1324_v19 = vpop.f32.mrb[28].mxu0  ;;  %v1356_v20 = vpop.f32.mrb[28].mxu1 }
 0x153   :  { %v1017_v21 = vadd.f32 %v1324_v19, %v1547_v40  ;;  %v1049_v22 = vadd.f32 %v1356_v20, %v1547_v40  ;;  %v642_v23 = vpop.f32.mrb[29].mxu0  ;;  %v770_v24 = vpop.f32.mrb[29].mxu1 }
 0x154   :  { %v1015_v25 = vadd.f32 %v1547_v40, %v642_v23  ;;  %v1047_v26 = vadd.f32 %v1547_v40, %v770_v24  ;;  %v1325_v27 = vpop.f32.mrb[30].mxu0  ;;  %v1357_v28 = vpop.f32.mrb[30].mxu1 }
 0x155   :  { %v1081_v29 = vmax.f32 %v1017_v21, 0.0  ;;  %v1113_v30 = vmax.f32 %v1049_v22, 0.0  ;;  %v1018_v31 = vadd.f32 %v1325_v27, %v1547_v40  ;;  %v1050_v32 = vadd.f32 %v1357_v28, %v1547_v40  ;;  %v645_v33 = vpop.f32.mrb[31].mxu0  ;;  %v773_v34 = vpop.f32.mrb[31].mxu1 }
 0x156   :  { %v1079_v35 = vmax.f32 %v1015_v25, 0.0  ;;  %v1111_v36 = vmax.f32 %v1047_v26, 0.0  ;;  %v1016_v37 = vadd.f32 %v1547_v40, %v645_v33  ;;  %v1048_v38 = vadd.f32 %v1547_v40, %v773_v34 }
 0x157   :  { %1145 = vst [vmem:[#allocation8 + $0xf0] sm:$0xff] %v1081_v29  ;;  %1177 = vst [vmem:[#allocation8 + $0x1f0] sm:$0xff] %v1113_v30  ;;  %v1082_v39 = vmax.f32 %v1018_v31, 0.0  ;;  %v1114_v41 = vmax.f32 %v1050_v32, 0.0 }
 0x158   :  { %1143 = vst [vmem:[#allocation8 + $0xe0] sm:$0xff] %v1079_v35  ;;  %1175 = vst [vmem:[#allocation8 + $0x1e0] sm:$0xff] %v1111_v36  ;;  %v1080_v42 = vmax.f32 %v1016_v37, 0.0  ;;  %v1112_v43 = vmax.f32 %v1048_v38, 0.0 }
 0x159   :  { %1146 = vst [vmem:[#allocation8 + $0xf8] sm:$0xff] %v1082_v39  ;;  %1178 = vst [vmem:[#allocation8 + $0x1f8] sm:$0xff] %v1114_v41 }
 0x15a   :  { %1144 = vst [vmem:[#allocation8 + $0xe8] sm:$0xff] %v1080_v42  ;;  %1176 = vst [vmem:[#allocation8 + $0x1e8] sm:$0xff] %v1112_v43 }
 0x15b   :  { %1476 = shalt.err (!%p1473_p6)
}
 0x15c   :  { %s1477_s15 = scalar_lea.hbm %s1628_s3, 8192 }
 0x15d   :  { %p1478_p7 = scmp.ne.s32.totalorder %s1628_s3, %s1477_s15  ;;  %p1481_p8 = scmp.lt.u32.totalorder %s1477_s15, %s1628_s3 }
 0x15f   :  { %p1483_p9 = pnand %p1481_p8, %p1478_p7 }
 0x161   :  { %1486 = shalt.err (!%p1483_p9)
}
 0x162   :  { %s1498_s20 = smov 128   ;;  %s1499_s21 = smov 8  }
 0x163   :  { %1190 = dma.vmem_to_hbm [thread:$0]  %s1185_s11, 8192, %s1628_s3, [#allocation5], %s1498_s20, %s1498_s20, %s1499_s21  }
 0x164   :  { %1491 = dma.done.wait [#allocation5], 8192  }
 0x165   :  { %1492 = vsyncadd [#allocation5], 4294959104 }
 0x166   :  { %1194 = vsyncpa [#allocation4], 1 }
 0x167   :  { %1195 = vsyncpa [#allocation7], 1 }
 0x168   :  { %1196 = vsyncpa [#allocation5], 1 }

</bundles_post_ra>
